<compile_context>
chip_gen: v6e
topology: v6e:2x2x1
jax: 0.10.0
libtpu: 0.0.40
codegen_flags: <defaults>
</compile_context>

<pallas_src>
import jax
import jax.numpy as jnp
from jax.experimental import pallas as pl
from jax.experimental.pallas import tpu as pltpu

LANE = 128
TN_MAX = 2048  # lanes per grid step (multiple of 128)


def _round_up(n, m):
    return ((n + m - 1) // m) * m


def harmonic_bias_kernel(coef_ref, offs_ref, xy_ref, out_ref):
    # coef_ref: VMEM (2, 1)  -> [[k_x / 2], [k_y / 2]]
    # offs_ref: VMEM (2, 1)  -> [[x_0], [y_0]]
    # xy_ref  : VMEM (2, TN) -> row 0 = x coords, row 1 = y coords (padding = offsets)
    # out_ref : SMEM (1, 1)  -> scalar energy, resident across the grid (accumulator)
    @pl.when(pl.program_id(0) == 0)
    def _():
        out_ref[0, 0] = jnp.float32(0.0)

    d = xy_ref[...] - offs_ref[...]                 # (2, TN) - (2, 1) lane-broadcast
    out_ref[0, 0] += jnp.sum(coef_ref[...] * d * d)  # single fused reduction


def harmonic_bias(positions, k_x, x_0, k_y, y_0, tn_max=TN_MAX):
    """Pallas wrapper: returns the scalar potential energy (f32)."""
    positions = jnp.asarray(positions, dtype=jnp.float32)
    n = positions.shape[0]

    n128 = _round_up(max(n, 1), LANE)
    tn = min(n128, tn_max)                 # multiple of 128
    n_pad = _round_up(n128, tn)            # multiple of tn
    grid = (n_pad // tn,)

    offs = jnp.array([x_0, y_0], dtype=jnp.float32).reshape(2, 1)
    coef = jnp.array([0.5 * k_x, 0.5 * k_y], dtype=jnp.float32).reshape(2, 1)

    # Lane-dense (2, N) slab: row 0 = x, row 1 = y.  z is never touched.
    xy = positions[:, :2].T
    pad = n_pad - n
    if pad > 0:
        # Pad with the offsets so padded lanes contribute exactly zero energy.
        xy = jnp.concatenate([xy, jnp.broadcast_to(offs, (2, pad))], axis=1)

    out = pl.pallas_call(
        harmonic_bias_kernel,
        out_shape=jax.ShapeDtypeStruct((1, 1), jnp.float32),
        grid_spec=pltpu.PrefetchScalarGridSpec(
            num_scalar_prefetch=0,
            grid=grid,
            in_specs=[
                pl.BlockSpec((2, 1), lambda i: (0, 0)),    # coef (resident)
                pl.BlockSpec((2, 1), lambda i: (0, 0)),    # offs (resident)
                pl.BlockSpec((2, tn), lambda i: (0, i)),   # xy tile (pipelined)
            ],
            out_specs=pl.BlockSpec(
                (1, 1), lambda i: (0, 0),
                memory_space=pltpu.MemorySpace.SMEM),
        ),
        compiler_params=pltpu.CompilerParams(
            dimension_semantics=("arbitrary",)),
    )(coef, offs, xy)
    return out[0, 0]


def harmonic_bias_ref(positions, k_x, x_0, k_y, y_0):
    """Pure-JAX reference mirroring the PyTorch forward exactly."""
    positions = positions.astype(jnp.float32)
    return (k_x / 2.0) * jnp.sum((positions[:, 0] - x_0) ** 2) + \
           (k_y / 2.0) * jnp.sum((positions[:, 1] - y_0) ** 2)


if __name__ == "__main__":
    # Deterministic parameters (module __init__ takes 4 floats).
    k_x, x_0 = 50.0, 1.25
    k_y, y_0 = 10.0, -0.5

    key = jax.random.PRNGKey(0)
    k1, k2 = jax.random.split(key)

    # Module-spec shape: (1, 3).
    pos_small = jax.random.normal(k1, (1, 3), dtype=jnp.float32)
    e_small = jax.block_until_ready(harmonic_bias(pos_small, k_x, x_0, k_y, y_0))
    ref_small = harmonic_bias_ref(pos_small, k_x, x_0, k_y, y_0)
    assert jnp.allclose(e_small, ref_small, rtol=1e-5, atol=1e-5), (e_small, ref_small)

    # Larger N exercises padding + the multi-tile accumulating grid (grid=(2,)).
    pos_big = jax.random.normal(k2, (2500, 3), dtype=jnp.float32)
    e_big = jax.block_until_ready(harmonic_bias(pos_big, k_x, x_0, k_y, y_0))
    ref_big = harmonic_bias_ref(pos_big, k_x, x_0, k_y, y_0)
    assert jnp.allclose(e_big, ref_big, rtol=1e-4, atol=1e-2), (e_big, ref_big)

    print("KERNEL_OK")
</pallas_src>

<mosaic_0001>
module attributes {stable_mosaic.version = 11 : i64} {
  func.func @harmonic_bias_kernel(%arg0: i32, %arg1: memref<2x1xf32, #tpu.memory_space<vmem>>, %arg2: memref<2x1xf32, #tpu.memory_space<vmem>>, %arg3: memref<2x128xf32, #tpu.memory_space<vmem>>, %arg4: memref<1x1xf32, #tpu.memory_space<smem>>) attributes {dimension_semantics = [#tpu.dimension_semantics<arbitrary>], iteration_bounds = array<i64: 1>, scalar_prefetch = 0 : i64, scratch_operands = 0 : i64, tpu.core_type = #tpu.core_type<tc>, window_params = [{pipeline_mode = #tpu.pipeline_mode<synchronous>, transform_indices = @transform_0, window_bounds = array<i64: 2, 1>}, {pipeline_mode = #tpu.pipeline_mode<synchronous>, transform_indices = @transform_1, window_bounds = array<i64: 2, 1>}, {transform_indices = @transform_2, window_bounds = array<i64: 2, 128>}, {transform_indices = @transform_3, window_bounds = array<i64: 1, 1>}]} {
    %c0_i32 = arith.constant 0 : i32
    %0 = arith.cmpi eq, %arg0, %c0_i32 : i32
    %1 = arith.extui %0 : i1 to i32
    %c0_i32_0 = arith.constant 0 : i32
    %2 = arith.cmpi ne, %1, %c0_i32_0 : i32
    scf.if %2 {
      %cst_10 = arith.constant 0.000000e+00 : f32
      %c0_11 = arith.constant 0 : index
      %c0_12 = arith.constant 0 : index
      %18 = memref.load %arg4[%c0_11, %c0_12] : memref<1x1xf32, #tpu.memory_space<smem>>
      memref.store %cst_10, %arg4[%c0_11, %c0_12] : memref<1x1xf32, #tpu.memory_space<smem>>
    } else {
    }
    %c0 = arith.constant 0 : index
    %c0_1 = arith.constant 0 : index
    %3 = vector.load %arg3[%c0, %c0_1] : memref<2x128xf32, #tpu.memory_space<vmem>>, vector<2x128xf32>
    %c0_2 = arith.constant 0 : index
    %c0_3 = arith.constant 0 : index
    %4 = vector.load %arg2[%c0_2, %c0_3] : memref<2x1xf32, #tpu.memory_space<vmem>>, vector<2x1xf32>
    %5 = vector.broadcast %4 : vector<2x1xf32> to vector<2x128xf32>
    %6 = arith.subf %3, %5 : vector<2x128xf32>
    %c0_4 = arith.constant 0 : index
    %c0_5 = arith.constant 0 : index
    %7 = memref.load %arg4[%c0_4, %c0_5] : memref<1x1xf32, #tpu.memory_space<smem>>
    %c0_6 = arith.constant 0 : index
    %c0_7 = arith.constant 0 : index
    %8 = vector.load %arg1[%c0_6, %c0_7] : memref<2x1xf32, #tpu.memory_space<vmem>>, vector<2x1xf32>
    %9 = vector.broadcast %8 : vector<2x1xf32> to vector<2x128xf32>
    %10 = arith.mulf %9, %6 : vector<2x128xf32>
    %11 = arith.mulf %10, %6 : vector<2x128xf32>
    %12 = vector.shape_cast %11 : vector<2x128xf32> to vector<1x2x128xf32>
    %cst = arith.constant dense<0.000000e+00> : vector<1xf32>
    %13 = vector.multi_reduction <add>, %12, %cst [1, 2] : vector<1x2x128xf32> to vector<1xf32>
    %14 = vector.shape_cast %13 : vector<1xf32> to vector<1x1x1xf32>
    %15 = vector.extract %14[0, 0, 0] : f32 from vector<1x1x1xf32>
    %16 = arith.addf %7, %15 : f32
    %c0_8 = arith.constant 0 : index
    %c0_9 = arith.constant 0 : index
    %17 = memref.load %arg4[%c0_8, %c0_9] : memref<1x1xf32, #tpu.memory_space<smem>>
    memref.store %16, %arg4[%c0_8, %c0_9] : memref<1x1xf32, #tpu.memory_space<smem>>
    return
  }
  func.func @transform_0(%arg0: i32) -> (i32, i32) {
    %c0_i32 = arith.constant 0 : i32
    %c0_i32_0 = arith.constant 0 : i32
    %c0_i32_1 = arith.constant 0 : i32
    return %c0_i32, %c0_i32_0 : i32, i32
  }
  func.func @transform_1(%arg0: i32) -> (i32, i32) {
    %c0_i32 = arith.constant 0 : i32
    %c0_i32_0 = arith.constant 0 : i32
    %c0_i32_1 = arith.constant 0 : i32
    return %c0_i32, %c0_i32_0 : i32, i32
  }
  func.func @transform_2(%arg0: i32) -> (i32, i32) {
    %c0_i32 = arith.constant 0 : i32
    %c0_i32_0 = arith.constant 0 : i32
    return %c0_i32, %arg0 : i32, i32
  }
  func.func @transform_3(%arg0: i32) -> (i32, i32) {
    %c0_i32 = arith.constant 0 : i32
    %c0_i32_0 = arith.constant 0 : i32
    %c0_i32_1 = arith.constant 0 : i32
    return %c0_i32, %c0_i32_0 : i32, i32
  }
}

</mosaic_0001>

<bundles_post_ra>
// kernel: tpu_custom_call.1
= control target key start
LH: loop header
LB: loop body
LE: loop exit
PB: predicated region body
PF: predicated region fallthrough
CT: control target
= control target key end

     0   :  { %v81_v1 = vmov 0   ;;  %s115_s0 = inlined_call_operand.vmem [shape: f32[2,1], index: 0, kind: input, shape index: {}]   ;;  %s116_s1 = inlined_call_operand.vmem [shape: f32[2,1], index: 1, kind: input, shape index: {}]   ;;  %s117_s2 = inlined_call_operand.vmem [shape: f32[2,128], index: 2, kind: input, shape index: {}]   ;;  %s118_s3 = inlined_call_operand.hbm [shape: f32[1,1], index: 3, kind: output, shape index: {}]  }
   0x1   :  { %v22_v0 = vld [vmem:[%s116_s1] sm:$0x3]  ;;  %70 = vset.pattern.permute.xlu0 %v81_v1 }
   0x2   :  { %8 = vsyncpa [#allocation3], 0  ;;  %25 = vperm.xlu0 %70, %v22_v0   ;;  %v30_v2 = vld [vmem:[%s115_s0] sm:$0x3]  ;;  %vm38_vm0 = vcmask 1041408   ;;  %s82_s1 = smov [#allocation2]  }
   0x3   :  { %v21_v4 = vld [vmem:[%s117_s2] sm:$0x3] }
   0x6   :  { %33 = vperm.xlu0 %70, %v30_v2  }
  0x7d   :  { %v26_v3 = vpop.permute.xlu0 %25 }
  0x7e   :  { %v28_v5 = vsub.f32 %v21_v4, %v26_v3 }
  0x81   :  { %v34_v6 = vpop.permute.xlu0 %33 }
  0x82   :  { %v36_v7 = vmul.f32 %v34_v6, %v28_v5 }
  0x84   :  { %v37_v8 = vmul.f32 %v36_v7, %v28_v5 }
  0x86   :  { %v39_v9 = vsel %vm38_vm0, %v37_v8, 0.0 }
  0x87   :  { %40 = vadd.xlane.f32.xlu1 %v39_v9 }
 0x110   :  { %v41_v10 = vpop.xlane.xlu1 %40 }
 0x111   :  { %v42_v11 = vrot.slane %v41_v10, 4 }
 0x113   :  { %v43_v12 = vadd.f32 %v42_v11, %v41_v10 }
 0x115   :  { %v44_v13 = vrot.slane %v43_v12, 2 }
 0x117   :  { %v45_v14 = vadd.f32 %v44_v13, %v43_v12 }
 0x119   :  { %v46_v15 = vrot.slane %v45_v14, 1 }
 0x11b   :  { %v47_v16 = vadd.f32 %v46_v15, %v45_v14 }
 0x11d   :  { %65 = vpush %v47_v16 }
 0x14e   :  { %s66_s0 = spop %65 }
 0x14f   :  { %51 = sst [smem:[#allocation2]] %s66_s0 }
 0x150   :  { %59 = dma.smem_to_hbm %s82_s1, 16, %s118_s3, [#allocation3]  }
 0x151   :  { %79 = dma.done.wait [#allocation3], 16  }
 0x152   :  { %80 = vsyncadd [#allocation3], 4294967280 }
 0x153   :  { %63 = sfence }
 0x154   :  { %64 = vsyncpa [#allocation3], 1 }

</bundles_post_ra>
